<compile_context>
chip_gen: v6e
topology: v6e:2x2x1
jax: 0.10.0
libtpu: 0.0.40
codegen_flags: <defaults>
</compile_context>

<pallas_src>
import functools

import jax
import jax.numpy as jnp
from jax.experimental import pallas as pl
from jax.experimental.pallas import tpu as pltpu

_NEG = -1.0e30  # "minus infinity" bias for padded action columns


def _round_up(n, m):
    return ((n + m - 1) // m) * m


def _policy_kernel(x_ref,
                   w1_ref, b1_ref,
                   w2_ref, b2_ref,
                   w3_ref, b3_ref,
                   w4_ref, b4_ref,
                   out_ref):
    # bf16 operands into the MXU, f32 accumulation; elementwise math in f32.
    x = x_ref[...].astype(jnp.bfloat16)

    h = jnp.dot(x, w1_ref[...], preferred_element_type=jnp.float32) + b1_ref[...]
    h = jnp.maximum(h, 0.0)

    h = jnp.dot(h.astype(jnp.bfloat16), w2_ref[...],
                preferred_element_type=jnp.float32) + b2_ref[...]
    h = jnp.maximum(h, 0.0)

    h = jnp.dot(h.astype(jnp.bfloat16), w3_ref[...],
                preferred_element_type=jnp.float32) + b3_ref[...]
    h = jnp.maximum(h, 0.0)

    logits = jnp.dot(h.astype(jnp.bfloat16), w4_ref[...],
                     preferred_element_type=jnp.float32) + b4_ref[...]

    # Numerically stable softmax over the (padded) action axis.  Padded
    # columns carry a -1e30 bias, so exp() underflows them to exactly 0.
    m = jnp.max(logits, axis=1, keepdims=True)
    e = jnp.exp(logits - m)
    denom = jnp.sum(e, axis=1, keepdims=True)
    inv = pl.reciprocal(denom, approx=True)      # EUP slot (free-ish)
    inv = inv * (2.0 - denom * inv)              # one Newton step -> f32 accuracy
    out_ref[...] = (e * inv).astype(out_ref.dtype)


def policy_forward(x, params, *, tb_max=512):
    """x: (B, obs_size) f32.  params: transposed f32 weights / (1, N) biases."""
    B, obs = x.shape
    act = params["w4"].shape[1]

    # ---- lane padding (zero pads are mathematically inert) ----------------
    obs_p = _round_up(obs, 128)
    h3_p = 128                      # hidden 64 -> 128
    act_p = _round_up(act, 128)

    w1 = jnp.pad(params["w1"], ((0, obs_p - obs), (0, 0))).astype(jnp.bfloat16)
    w2 = params["w2"].astype(jnp.bfloat16)
    w3 = jnp.pad(params["w3"], ((0, 0), (0, h3_p - 64))).astype(jnp.bfloat16)
    w4 = jnp.pad(params["w4"],
                 ((0, h3_p - 64), (0, act_p - act))).astype(jnp.bfloat16)
    b1 = params["b1"]
    b2 = params["b2"]
    b3 = jnp.pad(params["b3"], ((0, 0), (0, h3_p - 64)))
    # Padded action columns get a huge negative bias -> zero softmax weight.
    b4 = jnp.pad(params["b4"], ((0, 0), (0, act_p - act)),
                 constant_values=jnp.float32(_NEG))

    # ---- batch tiling ------------------------------------------------------
    tb = min(tb_max, _round_up(B, 8))      # multiple of 8 (and 256 when large)
    b_pad = _round_up(B, tb)
    x_p = jnp.pad(x, ((0, b_pad - B), (0, obs_p - obs)))

    grid = (b_pad // tb,)
    resident = lambda i: (0, 0)            # weights/biases stay put in VMEM

    out_padded = pl.pallas_call(
        _policy_kernel,
        out_shape=jax.ShapeDtypeStruct((b_pad, act_p), jnp.float32),
        grid=grid,
        in_specs=[
            pl.BlockSpec((tb, obs_p), lambda i: (i, 0)),     # x tile
            pl.BlockSpec((obs_p, 512), resident),            # w1
            pl.BlockSpec((1, 512), resident),                # b1
            pl.BlockSpec((512, 128), resident),              # w2
            pl.BlockSpec((1, 128), resident),                # b2
            pl.BlockSpec((128, h3_p), resident),             # w3
            pl.BlockSpec((1, h3_p), resident),               # b3
            pl.BlockSpec((h3_p, act_p), resident),           # w4
            pl.BlockSpec((1, act_p), resident),              # b4
        ],
        out_specs=pl.BlockSpec((tb, act_p), lambda i: (i, 0)),
        compiler_params=pltpu.CompilerParams(
            dimension_semantics=("parallel",)),
    )(x_p, w1, b1, w2, b2, w3, b3, w4, b4)

    return out_padded[:B, :act]


def init_params(key, obs_size, act_size):
    """nn.Linear-style init (uniform +/- 1/sqrt(fan_in)), weights pre-transposed
    to (in_features, out_features), biases as (1, out_features) rows."""
    dims = [(obs_size, 512), (512, 128), (128, 64), (64, act_size)]
    params = {}
    for i, (fan_in, fan_out) in enumerate(dims, start=1):
        key, kw, kb = jax.random.split(key, 3)
        bound = 1.0 / jnp.sqrt(jnp.float32(fan_in))
        params[f"w{i}"] = jax.random.uniform(
            kw, (fan_in, fan_out), jnp.float32, minval=-bound, maxval=bound)
        params[f"b{i}"] = jax.random.uniform(
            kb, (1, fan_out), jnp.float32, minval=-bound, maxval=bound)
    return params


def _bf16(a):
    return a.astype(jnp.bfloat16).astype(jnp.float32)


def policy_reference_bf16(x, p):
    """Emulates the kernel's bf16-operand / f32-accumulate matmuls."""
    dense = lambda a, w, b: _bf16(a) @ _bf16(w) + b
    h = jnp.maximum(dense(x, p["w1"], p["b1"]), 0.0)
    h = jnp.maximum(dense(h, p["w2"], p["b2"]), 0.0)
    h = jnp.maximum(dense(h, p["w3"], p["b3"]), 0.0)
    return jax.nn.softmax(dense(h, p["w4"], p["b4"]), axis=1)


def policy_reference_f32(x, p):
    h = jnp.maximum(x @ p["w1"] + p["b1"], 0.0)
    h = jnp.maximum(h @ p["w2"] + p["b2"], 0.0)
    h = jnp.maximum(h @ p["w3"] + p["b3"], 0.0)
    return jax.nn.softmax(h @ p["w4"] + p["b4"], axis=1)


if __name__ == "__main__":
    obs_size = 32
    act_size = 8
    batch = 8

    key = jax.random.PRNGKey(0)
    key, kx = jax.random.split(key)
    x = jax.random.normal(kx, (batch, obs_size), jnp.float32)
    params = init_params(key, obs_size, act_size)

    probs = jax.block_until_ready(policy_forward(x, params))

    assert probs.shape == (batch, act_size)
    assert jnp.allclose(jnp.sum(probs, axis=1), 1.0, atol=1e-5)

    ref_bf16 = policy_reference_bf16(x, params)
    ref_f32 = policy_reference_f32(x, params)
    assert jnp.allclose(probs, ref_bf16, atol=1e-4, rtol=1e-4), \
        float(jnp.max(jnp.abs(probs - ref_bf16)))
    assert jnp.allclose(probs, ref_f32, atol=2e-2), \
        float(jnp.max(jnp.abs(probs - ref_f32)))

    print("KERNEL_OK")
</pallas_src>

<mosaic_0001>
module attributes {stable_mosaic.version = 11 : i64} {
  func.func @_policy_kernel(%arg0: i32, %arg1: memref<8x128xf32, #tpu.memory_space<vmem>>, %arg2: memref<128x512xbf16, #tpu.memory_space<vmem>>, %arg3: memref<1x512xf32, #tpu.memory_space<vmem>>, %arg4: memref<512x128xbf16, #tpu.memory_space<vmem>>, %arg5: memref<1x128xf32, #tpu.memory_space<vmem>>, %arg6: memref<128x128xbf16, #tpu.memory_space<vmem>>, %arg7: memref<1x128xf32, #tpu.memory_space<vmem>>, %arg8: memref<128x128xbf16, #tpu.memory_space<vmem>>, %arg9: memref<1x128xf32, #tpu.memory_space<vmem>>, %arg10: memref<8x128xf32, #tpu.memory_space<vmem>>) attributes {dimension_semantics = [#tpu.dimension_semantics<parallel>], iteration_bounds = array<i64: 1>, scalar_prefetch = 0 : i64, scratch_operands = 0 : i64, tpu.core_type = #tpu.core_type<tc>, window_params = [{transform_indices = @transform_0, window_bounds = array<i64: 8, 128>}, {pipeline_mode = #tpu.pipeline_mode<synchronous>, transform_indices = @transform_1, window_bounds = array<i64: 128, 512>}, {pipeline_mode = #tpu.pipeline_mode<synchronous>, transform_indices = @transform_2, window_bounds = array<i64: 1, 512>}, {pipeline_mode = #tpu.pipeline_mode<synchronous>, transform_indices = @transform_3, window_bounds = array<i64: 512, 128>}, {pipeline_mode = #tpu.pipeline_mode<synchronous>, transform_indices = @transform_4, window_bounds = array<i64: 1, 128>}, {pipeline_mode = #tpu.pipeline_mode<synchronous>, transform_indices = @transform_5, window_bounds = array<i64: 128, 128>}, {pipeline_mode = #tpu.pipeline_mode<synchronous>, transform_indices = @transform_6, window_bounds = array<i64: 1, 128>}, {pipeline_mode = #tpu.pipeline_mode<synchronous>, transform_indices = @transform_7, window_bounds = array<i64: 128, 128>}, {pipeline_mode = #tpu.pipeline_mode<synchronous>, transform_indices = @transform_8, window_bounds = array<i64: 1, 128>}, {transform_indices = @transform_9, window_bounds = array<i64: 8, 128>}]} {
    %c0 = arith.constant 0 : index
    %c0_0 = arith.constant 0 : index
    %0 = vector.load %arg1[%c0, %c0_0] : memref<8x128xf32, #tpu.memory_space<vmem>>, vector<8x128xf32>
    %1 = arith.truncf %0 : vector<8x128xf32> to vector<8x128xbf16>
    %c0_1 = arith.constant 0 : index
    %c0_2 = arith.constant 0 : index
    %2 = vector.load %arg2[%c0_1, %c0_2] : memref<128x512xbf16, #tpu.memory_space<vmem>>, vector<128x512xbf16>
    %cst = arith.constant dense<0.000000e+00> : vector<8x512xf32>
    %3 = tpu.matmul %1, %2, %cst {dimension_numbers = #tpu.dot_dimension_numbers<[1], [0], [0], [1], [0, 0, 1, 1], [], []>} : vector<8x128xbf16>, vector<128x512xbf16>, vector<8x512xf32> -> vector<8x512xf32>
    %c0_3 = arith.constant 0 : index
    %c0_4 = arith.constant 0 : index
    %4 = vector.load %arg3[%c0_3, %c0_4] : memref<1x512xf32, #tpu.memory_space<vmem>>, vector<1x512xf32>
    %5 = vector.broadcast %4 : vector<1x512xf32> to vector<8x512xf32>
    %6 = arith.addf %3, %5 : vector<8x512xf32>
    %cst_5 = arith.constant 0.000000e+00 : f32
    %7 = vector.broadcast %cst_5 : f32 to vector<8x512xf32>
    %8 = arith.maximumf %6, %7 : vector<8x512xf32>
    %9 = arith.truncf %8 : vector<8x512xf32> to vector<8x512xbf16>
    %c0_6 = arith.constant 0 : index
    %c0_7 = arith.constant 0 : index
    %10 = vector.load %arg4[%c0_6, %c0_7] : memref<512x128xbf16, #tpu.memory_space<vmem>>, vector<512x128xbf16>
    %cst_8 = arith.constant dense<0.000000e+00> : vector<8x128xf32>
    %11 = tpu.matmul %9, %10, %cst_8 {dimension_numbers = #tpu.dot_dimension_numbers<[1], [0], [0], [1], [0, 0, 1, 1], [], []>} : vector<8x512xbf16>, vector<512x128xbf16>, vector<8x128xf32> -> vector<8x128xf32>
    %c0_9 = arith.constant 0 : index
    %c0_10 = arith.constant 0 : index
    %12 = vector.load %arg5[%c0_9, %c0_10] : memref<1x128xf32, #tpu.memory_space<vmem>>, vector<1x128xf32>
    %13 = vector.broadcast %12 : vector<1x128xf32> to vector<8x128xf32>
    %14 = arith.addf %11, %13 : vector<8x128xf32>
    %cst_11 = arith.constant 0.000000e+00 : f32
    %15 = vector.broadcast %cst_11 : f32 to vector<8x128xf32>
    %16 = arith.maximumf %14, %15 : vector<8x128xf32>
    %17 = arith.truncf %16 : vector<8x128xf32> to vector<8x128xbf16>
    %c0_12 = arith.constant 0 : index
    %c0_13 = arith.constant 0 : index
    %18 = vector.load %arg6[%c0_12, %c0_13] : memref<128x128xbf16, #tpu.memory_space<vmem>>, vector<128x128xbf16>
    %cst_14 = arith.constant dense<0.000000e+00> : vector<8x128xf32>
    %19 = tpu.matmul %17, %18, %cst_14 {dimension_numbers = #tpu.dot_dimension_numbers<[1], [0], [0], [1], [0, 0, 1, 1], [], []>} : vector<8x128xbf16>, vector<128x128xbf16>, vector<8x128xf32> -> vector<8x128xf32>
    %c0_15 = arith.constant 0 : index
    %c0_16 = arith.constant 0 : index
    %20 = vector.load %arg7[%c0_15, %c0_16] : memref<1x128xf32, #tpu.memory_space<vmem>>, vector<1x128xf32>
    %21 = vector.broadcast %20 : vector<1x128xf32> to vector<8x128xf32>
    %22 = arith.addf %19, %21 : vector<8x128xf32>
    %cst_17 = arith.constant 0.000000e+00 : f32
    %23 = vector.broadcast %cst_17 : f32 to vector<8x128xf32>
    %24 = arith.maximumf %22, %23 : vector<8x128xf32>
    %25 = arith.truncf %24 : vector<8x128xf32> to vector<8x128xbf16>
    %c0_18 = arith.constant 0 : index
    %c0_19 = arith.constant 0 : index
    %26 = vector.load %arg8[%c0_18, %c0_19] : memref<128x128xbf16, #tpu.memory_space<vmem>>, vector<128x128xbf16>
    %cst_20 = arith.constant dense<0.000000e+00> : vector<8x128xf32>
    %27 = tpu.matmul %25, %26, %cst_20 {dimension_numbers = #tpu.dot_dimension_numbers<[1], [0], [0], [1], [0, 0, 1, 1], [], []>} : vector<8x128xbf16>, vector<128x128xbf16>, vector<8x128xf32> -> vector<8x128xf32>
    %c0_21 = arith.constant 0 : index
    %c0_22 = arith.constant 0 : index
    %28 = vector.load %arg9[%c0_21, %c0_22] : memref<1x128xf32, #tpu.memory_space<vmem>>, vector<1x128xf32>
    %29 = vector.broadcast %28 : vector<1x128xf32> to vector<8x128xf32>
    %30 = arith.addf %27, %29 : vector<8x128xf32>
    %cst_23 = arith.constant dense<0xFF800000> : vector<8xf32>
    %31 = vector.multi_reduction <maximumf>, %30, %cst_23 [1] : vector<8x128xf32> to vector<8xf32>
    %32 = vector.shape_cast %31 : vector<8xf32> to vector<8x1xf32>
    %33 = vector.broadcast %32 : vector<8x1xf32> to vector<8x128xf32>
    %34 = arith.subf %30, %33 : vector<8x128xf32>
    %35 = math.exp %34 : vector<8x128xf32>
    %cst_24 = arith.constant dense<0.000000e+00> : vector<8xf32>
    %36 = vector.multi_reduction <add>, %35, %cst_24 [1] : vector<8x128xf32> to vector<8xf32>
    %37 = vector.shape_cast %36 : vector<8xf32> to vector<8x1xf32>
    %38 = tpu.reciprocal %37 {approx = true} : vector<8x1xf32> -> vector<8x1xf32>
    %39 = arith.mulf %37, %38 : vector<8x1xf32>
    %cst_25 = arith.constant 2.000000e+00 : f32
    %40 = vector.broadcast %cst_25 : f32 to vector<8x1xf32>
    %41 = arith.subf %40, %39 : vector<8x1xf32>
    %42 = arith.mulf %38, %41 : vector<8x1xf32>
    %43 = vector.broadcast %42 : vector<8x1xf32> to vector<8x128xf32>
    %44 = arith.mulf %35, %43 : vector<8x128xf32>
    %c0_26 = arith.constant 0 : index
    %c0_27 = arith.constant 0 : index
    %45 = vector.load %arg10[%c0_26, %c0_27] : memref<8x128xf32, #tpu.memory_space<vmem>>, vector<8x128xf32>
    tpu.vector_store %arg10[%c0_26, %c0_27], %44 {strides = array<i32>} : memref<8x128xf32, #tpu.memory_space<vmem>>, vector<8x128xf32>,
    return
  }
  func.func @transform_0(%arg0: i32) -> (i32, i32) {
    %c0_i32 = arith.constant 0 : i32
    %c0_i32_0 = arith.constant 0 : i32
    return %arg0, %c0_i32 : i32, i32
  }
  func.func @transform_1(%arg0: i32) -> (i32, i32) {
    %c0_i32 = arith.constant 0 : i32
    %c0_i32_0 = arith.constant 0 : i32
    %c0_i32_1 = arith.constant 0 : i32
    return %c0_i32, %c0_i32_0 : i32, i32
  }
  func.func @transform_2(%arg0: i32) -> (i32, i32) {
    %c0_i32 = arith.constant 0 : i32
    %c0_i32_0 = arith.constant 0 : i32
    %c0_i32_1 = arith.constant 0 : i32
    return %c0_i32, %c0_i32_0 : i32, i32
  }
  func.func @transform_3(%arg0: i32) -> (i32, i32) {
    %c0_i32 = arith.constant 0 : i32
    %c0_i32_0 = arith.constant 0 : i32
    %c0_i32_1 = arith.constant 0 : i32
    return %c0_i32, %c0_i32_0 : i32, i32
  }
  func.func @transform_4(%arg0: i32) -> (i32, i32) {
    %c0_i32 = arith.constant 0 : i32
    %c0_i32_0 = arith.constant 0 : i32
    %c0_i32_1 = arith.constant 0 : i32
    return %c0_i32, %c0_i32_0 : i32, i32
  }
  func.func @transform_5(%arg0: i32) -> (i32, i32) {
    %c0_i32 = arith.constant 0 : i32
    %c0_i32_0 = arith.constant 0 : i32
    %c0_i32_1 = arith.constant 0 : i32
    return %c0_i32, %c0_i32_0 : i32, i32
  }
  func.func @transform_6(%arg0: i32) -> (i32, i32) {
    %c0_i32 = arith.constant 0 : i32
    %c0_i32_0 = arith.constant 0 : i32
    %c0_i32_1 = arith.constant 0 : i32
    return %c0_i32, %c0_i32_0 : i32, i32
  }
  func.func @transform_7(%arg0: i32) -> (i32, i32) {
    %c0_i32 = arith.constant 0 : i32
    %c0_i32_0 = arith.constant 0 : i32
    %c0_i32_1 = arith.constant 0 : i32
    return %c0_i32, %c0_i32_0 : i32, i32
  }
  func.func @transform_8(%arg0: i32) -> (i32, i32) {
    %c0_i32 = arith.constant 0 : i32
    %c0_i32_0 = arith.constant 0 : i32
    %c0_i32_1 = arith.constant 0 : i32
    return %c0_i32, %c0_i32_0 : i32, i32
  }
  func.func @transform_9(%arg0: i32) -> (i32, i32) {
    %c0_i32 = arith.constant 0 : i32
    %c0_i32_0 = arith.constant 0 : i32
    return %arg0, %c0_i32 : i32, i32
  }
}

</mosaic_0001>

<bundles_post_ra>
// kernel: tpu_custom_call.1
= control target key start
LH: loop header
LB: loop body
LE: loop exit
PB: predicated region body
PF: predicated region fallthrough
CT: control target
= control target key end

     0   :  { %14 = vsyncpa [#allocation3], 0  ;;  %s1588_s0 = inlined_call_operand.hbm [shape: f32[8,128], index: 0, kind: input, shape index: {}]   ;;  %s1589_s1 = inlined_call_operand.hbm [shape: bf16[128,512], index: 1, kind: input, shape index: {}]   ;;  %s1590_s2 = inlined_call_operand.hbm [shape: f32[1,512], index: 2, kind: input, shape index: {}]   ;;  %s1591_s3 = inlined_call_operand.hbm [shape: bf16[512,128], index: 3, kind: input, shape index: {}]   ;;  %s1592_s4 = inlined_call_operand.vmem [shape: f32[1,128], index: 4, kind: input, shape index: {}]   ;;  %s1593_s5 = inlined_call_operand.hbm [shape: bf16[128,128], index: 5, kind: input, shape index: {}]   ;;  %s1594_s6 = inlined_call_operand.vmem [shape: f32[1,128], index: 6, kind: input, shape index: {}]   ;;  %s1595_s7 = inlined_call_operand.hbm [shape: bf16[128,128], index: 7, kind: input, shape index: {}]   ;;  %s1596_s8 = inlined_call_operand.vmem [shape: f32[1,128], index: 8, kind: input, shape index: {}]   ;;  %s1597_s9 = inlined_call_operand.hbm [shape: f32[8,128], index: 9, kind: output, shape index: {}]  }
   0x1   :  { %15 = vsyncpa [#allocation6], 0 }
   0x2   :  { %16 = vsyncpa [#allocation9], 0 }
   0x3   :  { %17 = vsyncpa [#allocation12], 0 }
   0x4   :  { %18 = vsyncpa [#allocation4], 0  ;;  %s1467_s30 = smov [#allocation5]  }
   0x5   :  { %s34_s10 = sshll.u32 %s1467_s30, 4  ;;  %s35_s10 = int_to_ptr.vmem [resolvable:$true] %s34_s10 }
   0x6   :  { %s1325_s11 = scalar_lea.vmem %s35_s10, 4096  ;;  %p1330_p1 = scmp.lt.s32.totalorder %s35_s10, %s35_s10 }
   0x7   :  { %p1326_p0 = scmp.ne.s32.totalorder %s35_s10, %s1325_s11  ;;  %p1331_p2 = scmp.lt.s32.totalorder %s1325_s11, %s1325_s11 }
   0x9   :  { %p1332_p3 = por %p1331_p2, %p1330_p1 }
   0xb   :  { %p1333_p4 = pnand %p1332_p3, %p1326_p0 }
   0xd   :  { %1336 = shalt.err (!%p1333_p4)
}
   0xe   :  { %s1468_s12 = smov 256   ;;  %s1469_s13 = smov 16  }
   0xf   :  { %40 = dma.hbm_to_vmem [thread:$0]  %s1589_s1, 4096, %s35_s10, [#allocation6], %s1468_s12, %s1468_s12, %s1469_s13  }
  0x10   :  { %s1470_s16 = smov [#allocation8]  }
  0x11   :  { %s56_s17 = sshll.u32 %s1470_s16, 4  ;;  %s57_s17 = int_to_ptr.vmem [resolvable:$true] %s56_s17 }
  0x12   :  { %s1345_s18 = scalar_lea.vmem %s57_s17, 4096  ;;  %p1350_p6 = scmp.lt.s32.totalorder %s57_s17, %s57_s17 }
  0x13   :  { %p1346_p5 = scmp.ne.s32.totalorder %s57_s17, %s1345_s18  ;;  %p1351_p7 = scmp.lt.s32.totalorder %s1345_s18, %s1345_s18 }
  0x15   :  { %p1352_p8 = por %p1351_p7, %p1350_p6 }
  0x17   :  { %p1353_p9 = pnand %p1352_p8, %p1346_p5 }
  0x19   :  { %1356 = shalt.err (!%p1353_p9)
}
  0x1a   :  { %s1471_s19 = smov 64   ;;  %s1472_s20 = smov 4  }
  0x1b   :  { %62 = dma.hbm_to_vmem [thread:$0]  %s1591_s3, 4096, %s57_s17, [#allocation9], %s1471_s19, %s1471_s19, %s1472_s20  }
  0x1c   :  { %s1473_s1 = smov [#allocation2]   ;;  %s1474_s24 = smov [#allocation7]  }
  0x1d   :  { %s25_s23 = sshll.u32 %s1473_s1, 4  ;;  %s47_s25 = sshll.u32 %s1474_s24, 4  ;;  %s26_s23 = int_to_ptr.vmem [resolvable:$true] %s25_s23  ;;  %s48_s25 = int_to_ptr.vmem [resolvable:$true] %s47_s25 }
  0x1e   :  { %s1365_s26 = scalar_lea.vmem %s26_s23, 128  ;;  %p1370_p11 = scmp.lt.s32.totalorder %s26_s23, %s26_s23 }
  0x1f   :  { %p1366_p10 = scmp.ne.s32.totalorder %s26_s23, %s1365_s26  ;;  %p1371_p12 = scmp.lt.s32.totalorder %s1365_s26, %s1365_s26 }
  0x21   :  { %p1372_p13 = por %p1371_p12, %p1370_p11 }
  0x23   :  { %p1373_p0 = pnand %p1372_p13, %p1366_p10 }
  0x25   :  { %1376 = shalt.err (!%p1373_p0)
}
  0x26   :  { %28 = dma.hbm_to_vmem [thread:$0]  %s1588_s0, 128, %s26_s23, [#allocation3]  }
  0x27   :  { %s1385_s29 = scalar_lea.vmem %s48_s25, 64  ;;  %p1390_p2 = scmp.lt.s32.totalorder %s48_s25, %s48_s25 }
  0x28   :  { %p1386_p1 = scmp.ne.s32.totalorder %s48_s25, %s1385_s29  ;;  %p1391_p3 = scmp.lt.s32.totalorder %s1385_s29, %s1385_s29 }
  0x2a   :  { %p1392_p4 = por %p1391_p3, %p1390_p2 }
  0x2c   :  { %p1393_p5 = pnand %p1392_p4, %p1386_p1 }
  0x2e   :  { %1396 = shalt.err (!%p1393_p5)
}
  0x2f   :  { %50 = dma.hbm_to_vmem [thread:$0]  %s1590_s2, 64, %s48_s25, [#allocation6]  }
  0x30   :  { %s1475_s10 = smov [#allocation10]   ;;  %s1476_s12 = smov [#allocation11]  }
  0x31   :  { %s70_s11 = sshll.u32 %s1475_s10, 4  ;;  %s84_s13 = sshll.u32 %s1476_s12, 4  ;;  %s71_s11 = int_to_ptr.vmem [resolvable:$true] %s70_s11  ;;  %s85_s13 = int_to_ptr.vmem [resolvable:$true] %s84_s13 }
  0x32   :  { %s1405_s14 = scalar_lea.vmem %s71_s11, 1024  ;;  %p1410_p7 = scmp.lt.s32.totalorder %s71_s11, %s71_s11 }
  0x33   :  { %p1406_p6 = scmp.ne.s32.totalorder %s71_s11, %s1405_s14  ;;  %p1411_p8 = scmp.lt.s32.totalorder %s1405_s14, %s1405_s14 }
  0x35   :  { %p1412_p9 = por %p1411_p8, %p1410_p7 }
  0x37   :  { %p1413_p10 = pnand %p1412_p9, %p1406_p6 }
  0x39   :  { %1416 = shalt.err (!%p1413_p10)
}
  0x3a   :  { %76 = dma.hbm_to_vmem [thread:$0]  %s1593_s5, 1024, %s71_s11, [#allocation9], %s1471_s19, %s1471_s19, %s1472_s20  }
  0x3b   :  { %s1425_s2 = scalar_lea.vmem %s85_s13, 1024  ;;  %p1430_p12 = scmp.lt.s32.totalorder %s85_s13, %s85_s13 }
  0x3c   :  { %p1426_p11 = scmp.ne.s32.totalorder %s85_s13, %s1425_s2  ;;  %p1431_p13 = scmp.lt.s32.totalorder %s1425_s2, %s1425_s2 }
  0x3e   :  { %p1432_p0 = por %p1431_p13, %p1430_p12 }
  0x40   :  { %p1433_p1 = pnand %p1432_p0, %p1426_p11 }
  0x42   :  { %1436 = shalt.err (!%p1433_p1)
}
  0x43   :  { %90 = dma.hbm_to_vmem [thread:$0]  %s1595_s7, 1024, %s85_s13, [#allocation12], %s1471_s19, %s1471_s19, %s1472_s20  }
  0x44   :  { %1457 = dma.done.wait [#allocation3], 128  }
  0x45   :  { %1458 = vsyncadd [#allocation3], 4294967168 }
  0x46   :  { %1459 = dma.done.wait [#allocation6], 4160  }
  0x47   :  { %1460 = vsyncadd [#allocation6], 4294963136 }
  0x48   :  { %1461 = dma.done.wait [#allocation9], 5120  }
  0x49   :  { %1462 = vsyncadd [#allocation9], 4294962176 }
  0x4a   :  { %1463 = dma.done.wait [#allocation12], 1024  }
  0x4b   :  { %1464 = vsyncadd [#allocation12], 4294966272  ;;  %v1477_v0 = vmov 0   ;;  %v1217_v1 = vld [vmem:[#allocation5 + $0xe4] ss:$16 sps:$4 sm:$0xff]   ;;  %v112_v33 = vld [vmem:[#allocation2] sm:$0xff] }
  0x4c   :  { %360 = vmatprep.mubr.bf16.mxu0 %v1477_v0  ;;  %401 = vmatprep.mubr.bf16.mxu1 %v1477_v0  ;;  %v1219_v2 = vld [vmem:[#allocation5 + $0xec] ss:$16 sps:$4 sm:$0xff]   ;;  %v1221_v3 = vld [vmem:[#allocation5 + $0xe0] ss:$16 sps:$4 sm:$0xff]   ;;  %v1222_v4 = vld [vmem:[#allocation5 + $0xe8] ss:$16 sps:$4 sm:$0xff]   ;;  %v113_v37 = vpack.c.bf16 %v112_v33, %v112_v33 }
  0x4d   :  { %328 = vmatprep.subr.bf16.mxu0 %v1217_v1  ;;  %369 = vmatprep.subr.bf16.mxu1 %v1219_v2  ;;  %v1223_v5 = vld [vmem:[#allocation5 + $0xc4] ss:$16 sps:$4 sm:$0xff]   ;;  %v1225_v6 = vld [vmem:[#allocation5 + $0xcc] ss:$16 sps:$4 sm:$0xff]   ;;  %v1227_v7 = vld [vmem:[#allocation5 + $0xc0] ss:$16 sps:$4 sm:$0xff]  }
  0x4e   :  { %329 = vmatpush1.bf16.msra.mxu0 %v1221_v3  ;;  %370 = vmatpush1.bf16.msra.mxu1 %v1222_v4  ;;  %v1228_v8 = vld [vmem:[#allocation5 + $0xc8] ss:$16 sps:$4 sm:$0xff]   ;;  %v1229_v9 = vld [vmem:[#allocation5 + $0xa4] ss:$16 sps:$4 sm:$0xff]   ;;  %v1231_v10 = vld [vmem:[#allocation5 + $0xac] ss:$16 sps:$4 sm:$0xff]   ;;  %v148_v4 = vlaneseq }
  0x4f   :  { %330 = vmatprep.subr.bf16.mxu0 %v1223_v5  ;;  %371 = vmatprep.subr.bf16.mxu1 %v1225_v6  ;;  %v1233_v11 = vld [vmem:[#allocation5 + $0xa0] ss:$16 sps:$4 sm:$0xff]   ;;  %v1234_v12 = vld [vmem:[#allocation5 + $0xa8] ss:$16 sps:$4 sm:$0xff]   ;;  %v1235_v13 = vld [vmem:[#allocation5 + $0x84] ss:$16 sps:$4 sm:$0xff]  }
  0x50   :  { %v1237_v14 = vld [vmem:[#allocation5 + $0x8c] ss:$16 sps:$4 sm:$0xff]   ;;  %v1239_v15 = vld [vmem:[#allocation5 + $0x80] ss:$16 sps:$4 sm:$0xff]   ;;  %v1240_v16 = vld [vmem:[#allocation5 + $0x88] ss:$16 sps:$4 sm:$0xff]  }
  0x51   :  { %v1241_v17 = vld [vmem:[#allocation5 + $0x64] ss:$16 sps:$4 sm:$0xff]   ;;  %v1243_v18 = vld [vmem:[#allocation5 + $0x6c] ss:$16 sps:$4 sm:$0xff]   ;;  %v1245_v19 = vld [vmem:[#allocation5 + $0x60] ss:$16 sps:$4 sm:$0xff]  }
  0x52   :  { %331 = vmatpush1.bf16.msra.mxu0 %v1227_v7  ;;  %372 = vmatpush1.bf16.msra.mxu1 %v1228_v8  ;;  %v1246_v20 = vld [vmem:[#allocation5 + $0x68] ss:$16 sps:$4 sm:$0xff]   ;;  %v1247_v21 = vld [vmem:[#allocation5 + $0x44] ss:$16 sps:$4 sm:$0xff]   ;;  %v1249_v22 = vld [vmem:[#allocation5 + $0x4c] ss:$16 sps:$4 sm:$0xff]  }
  0x53   :  { %332 = vmatprep.subr.bf16.mxu0 %v1229_v9  ;;  %373 = vmatprep.subr.bf16.mxu1 %v1231_v10  ;;  %v1251_v23 = vld [vmem:[#allocation5 + $0x40] ss:$16 sps:$4 sm:$0xff]   ;;  %v1252_v24 = vld [vmem:[#allocation5 + $0x48] ss:$16 sps:$4 sm:$0xff]   ;;  %v1253_v25 = vld [vmem:[#allocation5 + $0x24] ss:$16 sps:$4 sm:$0xff]  }
  0x54   :  { %v1255_v26 = vld [vmem:[#allocation5 + $0x2c] ss:$16 sps:$4 sm:$0xff]   ;;  %v1257_v27 = vld [vmem:[#allocation5 + $0x20] ss:$16 sps:$4 sm:$0xff]   ;;  %v1258_v28 = vld [vmem:[#allocation5 + $0x28] ss:$16 sps:$4 sm:$0xff]  }
  0x55   :  { %v1259_v29 = vld [vmem:[#allocation5 + $0x4] ss:$16 sps:$4 sm:$0xff]   ;;  %v1261_v30 = vld [vmem:[#allocation5 + $0xc] ss:$16 sps:$4 sm:$0xff]   ;;  %v1263_v31 = vld [vmem:[#allocation5] ss:$16 sps:$4 sm:$0xff]  }
  0x56   :  { %333 = vmatpush1.bf16.msra.mxu0 %v1233_v11  ;;  %374 = vmatpush1.bf16.msra.mxu1 %v1234_v12  ;;  %v1264_v32 = vld [vmem:[#allocation5 + $0x8] ss:$16 sps:$4 sm:$0xff]   ;;  %v1265_v34 = vld [vmem:[#allocation8 + $0x78] sm:$0xff]   ;;  %v1273_v43 = vld [vmem:[#allocation8 + $0x68] sm:$0xff]   ;;  %v1478_v3 = vmov 0.0   ;;  %v149_v5 = vshrl.u32 %v148_v4, 7 }
  0x57   :  { %334 = vmatprep.subr.bf16.mxu0 %v1235_v13  ;;  %375 = vmatprep.subr.bf16.mxu1 %v1237_v14  ;;  %v1266_v35 = vld [vmem:[#allocation8 + $0xf8] sm:$0xff]   ;;  %v1269_v39 = vld [vmem:[#allocation8 + $0x70] sm:$0xff]   ;;  %v1274_v44 = vld [vmem:[#allocation8 + $0xe8] sm:$0xff]   ;;  %vm1479_vm0 = vmmov 0  }
  0x58   :  { %v1267_v36 = vld [vmem:[#allocation8 + $0x38] sm:$0xff]   ;;  %v1270_v40 = vld [vmem:[#allocation8 + $0xf0] sm:$0xff]   ;;  %v1275_v45 = vld [vmem:[#allocation8 + $0x28] sm:$0xff]   ;;  %v150_v6 = vsub.s32 0, %v149_v5  ;;  %v158_v7 = vsub.s32 2, %v149_v5  ;;  %v154_v9 = vsub.s32 1, %v149_v5 }
  0x59   :  { %v1268_v38 = vld [vmem:[#allocation8 + $0xb8] sm:$0xff]   ;;  %v1271_v41 = vld [vmem:[#allocation8 + $0x30] sm:$0xff]   ;;  %v1276_v46 = vld [vmem:[#allocation8 + $0xa8] sm:$0xff]   ;;  %v162_v10 = vsub.s32 3, %v149_v5 }
  0x5a   :  { %335 = vmatpush1.bf16.msra.mxu0 %v1239_v15  ;;  %376 = vmatpush1.bf16.msra.mxu1 %v1240_v16  ;;  %v1272_v42 = vld [vmem:[#allocation8 + $0xb0] sm:$0xff]   ;;  %v1277_v47 = vld [vmem:[#allocation8 + $0x60] sm:$0xff]   ;;  %v1281_v51 = vld [vmem:[#allocation8 + $0x58] sm:$0xff]  }
  0x5b   :  { %336 = vmatprep.subr.bf16.mxu0 %v1241_v17  ;;  %377 = vmatprep.subr.bf16.mxu1 %v1243_v18  ;;  %v1278_v48 = vld [vmem:[#allocation8 + $0xe0] sm:$0xff]   ;;  %v1282_v52 = vld [vmem:[#allocation8 + $0xd8] sm:$0xff]   ;;  %v1285_v55 = vld [vmem:[#allocation8 + $0x50] sm:$0xff]  }
  0x5c   :  { %v1279_v49 = vld [vmem:[#allocation8 + $0x20] sm:$0xff]   ;;  %v1283_v53 = vld [vmem:[#allocation8 + $0x18] sm:$0xff]   ;;  %v1286_v56 = vld [vmem:[#allocation8 + $0xd0] sm:$0xff]  }
  0x5d   :  { %v1280_v50 = vld [vmem:[#allocation8 + $0xa0] sm:$0xff]   ;;  %v1284_v54 = vld [vmem:[#allocation8 + $0x98] sm:$0xff]   ;;  %v1287_v57 = vld [vmem:[#allocation8 + $0x10] sm:$0xff]  }
  0x5e   :  { %337 = vmatpush1.bf16.msra.mxu0 %v1245_v19  ;;  %378 = vmatpush1.bf16.msra.mxu1 %v1246_v20  ;;  %v1288_v58 = vld [vmem:[#allocation8 + $0x90] sm:$0xff]   ;;  %v1289_v59 = vld [vmem:[#allocation8 + $0x48] sm:$0xff]   ;;  %v1293_v63 = vld [vmem:[#allocation8 + $0x40] sm:$0xff]  }
  0x5f   :  { %338 = vmatprep.subr.bf16.mxu0 %v1247_v21  ;;  %379 = vmatprep.subr.bf16.mxu1 %v1249_v22  ;;  %v1290_v60 = vld [vmem:[#allocation8 + $0xc8] sm:$0xff]   ;;  %v1294_v0 = vld [vmem:[#allocation8 + $0xc0] sm:$0xff]   ;;  %v146_v8 = vld [vmem:[#allocation7] sm:$0xf] }
  0x60   :  { %v1291_v61 = vld [vmem:[#allocation8 + $0x8] sm:$0xff]   ;;  %v1295_v1 = vld [vmem:[#allocation8] sm:$0xff]   ;;  %v151_v11 = vrot.slane %v146_v8, %v150_v6  ;;  %v159_v12 = vrot.slane %v146_v8, %v158_v7  ;;  %v155_v13 = vrot.slane %v146_v8, %v154_v9  ;;  %v163_v14 = vrot.slane %v146_v8, %v162_v10 }
  0x61   :  { %v1292_v62 = vld [vmem:[#allocation8 + $0x88] sm:$0xff]   ;;  %v1296_v2 = vld [vmem:[#allocation8 + $0x80] sm:$0xff]  }
  0x62   :  { %339 = vmatpush1.bf16.msra.mxu0 %v1251_v23  ;;  %380 = vmatpush1.bf16.msra.mxu1 %v1252_v24 }
  0x63   :  { %340 = vmatprep.subr.bf16.mxu0 %v1253_v25  ;;  %381 = vmatprep.subr.bf16.mxu1 %v1255_v26 }
  0x66   :  { %341 = vmatpush1.bf16.msra.mxu0 %v1257_v27  ;;  %382 = vmatpush1.bf16.msra.mxu1 %v1258_v28 }
  0x67   :  { %342 = vmatprep.subr.bf16.mxu0 %v1259_v29  ;;  %383 = vmatprep.subr.bf16.mxu1 %v1261_v30 }
  0x6a   :  { %343 = vmatpush1.bf16.msra.mxu0 %v1263_v31  ;;  %384 = vmatpush1.bf16.msra.mxu1 %v1264_v32 }
  0x6b   :  { %1101 = vmatprep.subr.bf16.mxu0 %v1265_v34  ;;  %1123 = vmatprep.subr.bf16.mxu1 %v1266_v35  ;;  %v1297_v34 = vld [vmem:[#allocation10 + $0x38] sm:$0xff]  }
  0x6d   :  { %361 = vmatmul.mubr.bf16.vlgmr.msra.gmra.mxu0 %v113_v37  ;;  %402 = vmatmul.mubr.bf16.vlgmr.msra.gmra.mxu1 %v113_v37  ;;  %v1299_v37 = vld [vmem:[#allocation10 + $0x28] sm:$0xff]  }
  0x6e   :  { %1102 = vmatpush3.bf16.msra.mxu0 %v1267_v36  ;;  %1124 = vmatpush3.bf16.msra.mxu1 %v1268_v38  ;;  %v1298_v36 = vld [vmem:[#allocation10 + $0x30] sm:$0xff]   ;;  %v1300_v38 = vld [vmem:[#allocation10 + $0x20] sm:$0xff]  }
  0x6f   :  { %1103 = vmatprep.subr.bf16.mxu0 %v1269_v39  ;;  %1125 = vmatprep.subr.bf16.mxu1 %v1270_v40  ;;  %v1301_v39 = vld [vmem:[#allocation10 + $0x18] sm:$0xff]   ;;  %v1302_v40 = vld [vmem:[#allocation10 + $0x10] sm:$0xff]  }
  0x72   :  { %1104 = vmatpush3.bf16.msra.mxu0 %v1271_v41  ;;  %1126 = vmatpush3.bf16.msra.mxu1 %v1272_v42  ;;  %v1303_v41 = vld [vmem:[#allocation10 + $0x8] sm:$0xff]   ;;  %v1304_v42 = vld [vmem:[#allocation10] sm:$0xff]  }
  0x73   :  { %1105 = vmatprep.subr.bf16.mxu0 %v1273_v43  ;;  %1127 = vmatprep.subr.bf16.mxu1 %v1274_v44  ;;  %v1305_v43 = vld [vmem:[#allocation11 + $0x38] sm:$0xff]   ;;  %v1306_v44 = vld [vmem:[#allocation11 + $0x30] sm:$0xff]  }
  0x76   :  { %1106 = vmatpush3.bf16.msra.mxu0 %v1275_v45  ;;  %1128 = vmatpush3.bf16.msra.mxu1 %v1276_v46  ;;  %v1307_v45 = vld [vmem:[#allocation11 + $0x28] sm:$0xff]   ;;  %v1308_v46 = vld [vmem:[#allocation11 + $0x20] sm:$0xff]  }
  0x77   :  { %1107 = vmatprep.subr.bf16.mxu0 %v1277_v47  ;;  %1129 = vmatprep.subr.bf16.mxu1 %v1278_v48  ;;  %v1309_v47 = vld [vmem:[#allocation11 + $0x18] sm:$0xff]   ;;  %v1310_v48 = vld [vmem:[#allocation11 + $0x10] sm:$0xff]  }
  0x7a   :  { %1108 = vmatpush3.bf16.msra.mxu0 %v1279_v49  ;;  %1130 = vmatpush3.bf16.msra.mxu1 %v1280_v50 }
  0x7b   :  { %1109 = vmatprep.subr.bf16.mxu0 %v1281_v51  ;;  %1131 = vmatprep.subr.bf16.mxu1 %v1282_v52  ;;  %v1050_v51 = vld [vmem:[%s1592_s4] ss:$0 sm:$0xff] }
  0x7e   :  { %1110 = vmatpush3.bf16.msra.mxu0 %v1283_v53  ;;  %1132 = vmatpush3.bf16.msra.mxu1 %v1284_v54 }
  0x7f   :  { %1111 = vmatprep.subr.bf16.mxu0 %v1285_v55  ;;  %1133 = vmatprep.subr.bf16.mxu1 %v1286_v56 }
  0x82   :  { %1112 = vmatpush3.bf16.msra.mxu0 %v1287_v57  ;;  %1134 = vmatpush3.bf16.msra.mxu1 %v1288_v58 }
  0x83   :  { %1113 = vmatprep.subr.bf16.mxu0 %v1289_v59  ;;  %1135 = vmatprep.subr.bf16.mxu1 %v1290_v60 }
  0x86   :  { %1114 = vmatpush3.bf16.msra.mxu0 %v1291_v61  ;;  %1136 = vmatpush3.bf16.msra.mxu1 %v1292_v62 }
  0x87   :  { %1115 = vmatprep.subr.bf16.mxu0 %v1293_v63  ;;  %1137 = vmatprep.subr.bf16.mxu1 %v1294_v0  ;;  %v1311_v0 = vld [vmem:[#allocation11 + $0x8] sm:$0xff]  }
  0x8a   :  { %1116 = vmatpush3.bf16.msra.mxu0 %v1295_v1  ;;  %1138 = vmatpush3.bf16.msra.mxu1 %v1296_v2  ;;  %v1312_v1 = vld [vmem:[#allocation11] sm:$0xff]   ;;  %v1083_v2 = vld [vmem:[%s1594_s6] ss:$0 sm:$0xff]  ;;  %s1480_s6 = smov [#allocation13]  }
  0x8b   :  { %1163 = vmatprep.subr.bf16.mxu0 %v1478_v3  ;;  %1183 = vmatprep.subr.bf16.mxu1 %v1478_v3  ;;  %s1006_s21 = sshll.u32 %s1480_s6, 4  ;;  %s1007_s21 = int_to_ptr.vmem [resolvable:$true] %s1006_s21 }
  0x8c   :  { %p1442_p3 = scmp.lt.s32.totalorder %s1007_s21, %s1007_s21 }
 0x12d   :  { %v362_v15 = vpop.f32.mrf.mxu0  ;;  %v403_v16 = vpop.f32.mrf.mxu1 }
 0x12e   :  { %v363_v17 = vadd.f32 %v362_v15, %v151_v11  ;;  %v404_v18 = vadd.f32 %v403_v16, %v159_v12  ;;  %v1092_v11 = vld [vmem:[%s1596_s8] ss:$0 sm:$0xff]  ;;  %s1437_s8 = scalar_lea.vmem %s1007_s21, 128 }
 0x12f   :  { %v364_v19 = vpop.f32.mrf.mxu0  ;;  %v405_v20 = vpop.f32.mrf.mxu1  ;;  %p1438_p2 = scmp.ne.s32.totalorder %s1007_s21, %s1437_s8  ;;  %p1443_p4 = scmp.lt.s32.totalorder %s1437_s8, %s1437_s8 }
 0x130   :  { %v412_v21 = vmax.f32 %v404_v18, 0.0  ;;  %v365_v22 = vadd.f32 %v364_v19, %v155_v13  ;;  %v406_v23 = vadd.f32 %v405_v20, %v163_v14  ;;  %v410_v24 = vmax.f32 %v363_v17, 0.0 }
 0x131   :  { %v366_v25 = vpop.f32.mrf.mxu0  ;;  %v407_v26 = vpop.f32.mrf.mxu1  ;;  %p1444_p5 = por %p1443_p4, %p1442_p3 }
 0x132   :  { %v411_v27 = vmax.f32 %v365_v22, 0.0  ;;  %v413_v28 = vmax.f32 %v406_v23, 0.0  ;;  %v416_v29 = vpack.c.bf16 %v412_v21, %v412_v21  ;;  %v414_v35 = vpack.c.bf16 %v410_v24, %v410_v24 }
 0x133   :  { %v367_v30 = vpop.f32.mrf.mxu0  ;;  %v408_v31 = vpop.f32.mrf.mxu1  ;;  %p1445_p6 = pnand %p1444_p5, %p1438_p2 }
 0x134   :  { %v415_v32 = vpack.c.bf16 %v411_v27, %v411_v27  ;;  %v417_v33 = vpack.c.bf16 %v413_v28, %v413_v28 }
 0x136   :  { %713 = vmatprep.mubr.bf16.mxu0 %v415_v32  ;;  %753 = vmatprep.mubr.bf16.mxu1 %v417_v33 }
 0x137   :  { %714 = vmatmul.mubr.bf16.vlgmr.msra.gmra.mxu0 %v414_v35  ;;  %754 = vmatmul.mubr.bf16.vlgmr.msra.gmra.mxu1 %v416_v29 }
 0x138   :  { %1164 = vmatpush3.bf16.msra.mxu0 %v1297_v34  ;;  %1179 = vmatprep.mubr.msk.bf16.mxu0 %vm1479_vm0, %v1478_v3 }
 0x139   :  { %1165 = vmatprep.subr.bf16.mxu0 %v1478_v3  ;;  %1199 = vmatprep.mubr.msk.bf16.mxu1 %vm1479_vm0, %v1478_v3 }
 0x13a   :  { %1184 = vmatpush3.bf16.msra.mxu1 %v1305_v43 }
 0x13b   :  { %1185 = vmatprep.subr.bf16.mxu1 %v1478_v3 }
 0x13c   :  { %1166 = vmatpush3.bf16.msra.mxu0 %v1298_v36 }
 0x13d   :  { %1167 = vmatprep.subr.bf16.mxu0 %v1478_v3 }
 0x13e   :  { %1186 = vmatpush3.bf16.msra.mxu1 %v1306_v44 }
 0x13f   :  { %1187 = vmatprep.subr.bf16.mxu1 %v1478_v3 }
 0x140   :  { %1168 = vmatpush3.bf16.msra.mxu0 %v1299_v37 }
 0x141   :  { %1169 = vmatprep.subr.bf16.mxu0 %v1478_v3 }
 0x142   :  { %1188 = vmatpush3.bf16.msra.mxu1 %v1307_v45 }
 0x143   :  { %1189 = vmatprep.subr.bf16.mxu1 %v1478_v3 }
 0x144   :  { %1170 = vmatpush3.bf16.msra.mxu0 %v1300_v38 }
 0x145   :  { %1171 = vmatprep.subr.bf16.mxu0 %v1478_v3 }
 0x146   :  { %1190 = vmatpush3.bf16.msra.mxu1 %v1308_v46 }
 0x147   :  { %1191 = vmatprep.subr.bf16.mxu1 %v1478_v3 }
 0x148   :  { %1172 = vmatpush3.bf16.msra.mxu0 %v1301_v39 }
 0x149   :  { %1173 = vmatprep.subr.bf16.mxu0 %v1478_v3 }
 0x14a   :  { %1192 = vmatpush3.bf16.msra.mxu1 %v1309_v47 }
 0x14b   :  { %1193 = vmatprep.subr.bf16.mxu1 %v1478_v3 }
 0x14c   :  { %1174 = vmatpush3.bf16.msra.mxu0 %v1302_v40 }
 0x14d   :  { %1175 = vmatprep.subr.bf16.mxu0 %v1478_v3 }
 0x14e   :  { %1194 = vmatpush3.bf16.msra.mxu1 %v1310_v48 }
 0x14f   :  { %1195 = vmatprep.subr.bf16.mxu1 %v1478_v3 }
 0x150   :  { %1176 = vmatpush3.bf16.msra.mxu0 %v1303_v41 }
 0x151   :  { %1177 = vmatprep.subr.bf16.mxu0 %v1478_v3 }
 0x152   :  { %1196 = vmatpush3.bf16.msra.mxu1 %v1311_v0 }
 0x153   :  { %1197 = vmatprep.subr.bf16.mxu1 %v1478_v3 }
 0x154   :  { %1178 = vmatpush3.bf16.msra.mxu0 %v1304_v42 }
 0x156   :  { %1198 = vmatpush3.bf16.msra.mxu1 %v1312_v1 }
 0x1f7   :  { %v1117_v49 = vpop.f32.mrf.mxu0  ;;  %v1139_v50 = vpop.f32.mrf.mxu1 }
 0x1f9   :  { %v1118_v52 = vpop.f32.mrf.mxu0  ;;  %v1140_v53 = vpop.f32.mrf.mxu1 }
 0x1fa   :  { %v1119_v54 = vadd.f32 %v1118_v52, %v1117_v49  ;;  %v1141_v58 = vadd.f32 %v1140_v53, %v1139_v50 }
 0x1fb   :  { %v1120_v55 = vpop.f32.mrf.mxu0  ;;  %v1142_v56 = vpop.f32.mrf.mxu1 }
 0x1fc   :  { %v716_v57 = vadd.f32 %v1119_v54, %v1050_v51 }
 0x1fd   :  { %v1121_v59 = vpop.f32.mrf.mxu0  ;;  %v1143_v60 = vpop.f32.mrf.mxu1 }
 0x1fe   :  { %v756_v61 = vadd.f32 %v1141_v58, %v716_v57 }
 0x200   :  { %v761_v62 = vmax.f32 %v756_v61, 0.0 }
 0x202   :  { %v762_v63 = vpack.c.bf16 %v761_v62, %v761_v62 }
 0x204   :  { %1180 = vmatmul.mubr.bf16.vlgmr.msra.gmra.mxu0 %v762_v63 }
 0x2c4   :  { %v868_v4 = vpop.f32.mrf.mxu0 }
 0x2c5   :  { %v869_v5 = vadd.f32 %v1083_v2, %v868_v4 }
 0x2c6   :  { %v1181_v6 = vpop.f32.mrf.mxu0 }
 0x2c7   :  { %v874_v7 = vmax.f32 %v869_v5, 0.0 }
 0x2c8   :  { %v871_v8 = vpop.f32.mrf.mxu0 }
 0x2c9   :  { %v875_v9 = vpack.c.bf16 %v874_v7, %v874_v7 }
 0x2ca   :  { %v1182_v10 = vpop.f32.mrf.mxu0 }
 0x2cb   :  { %1200 = vmatmul.mubr.bf16.vlgmr.msra.gmra.mxu1 %v875_v9 }
 0x38b   :  { %v981_v12 = vpop.f32.mrf.mxu1 }
 0x38c   :  { %v982_v3 = vadd.f32 %v1092_v11, %v981_v12 }
 0x38d   :  { %v1201_v13 = vpop.f32.mrf.mxu1 }
 0x38e   :  { %987 = vmax.xlane.f32.xlu0 %v982_v3 }
 0x38f   :  { %v984_v14 = vpop.f32.mrf.mxu1 }
 0x391   :  { %v1202_v15 = vpop.f32.mrf.mxu1 }
 0x417   :  { %v988_v16 = vpop.xlane.xlu0 %987 }
 0x418   :  { %v989_v17 = vsub.f32 %v982_v3, %v988_v16 }
 0x41a   :  { %v990_v18 = vmul.f32 1.442695, %v989_v17 }
 0x41c   :  { %1313 = vpow2.f32 %v990_v18 }
 0x429   :  { %v1314_v19 = vpop.eup %1313 }
 0x42a   :  { %992 = vadd.xlane.f32.xlu0 %v1314_v19 }
 0x4b3   :  { %v993_v20 = vpop.xlane.xlu0 %992 }
 0x4b4   :  { %1315 = vrcp.f32 %v993_v20 }
 0x4c1   :  { %v1316_v21 = vpop.eup %1315 }
 0x4c2   :  { %v995_v22 = vmul.f32 %v1316_v21, %v993_v20 }
 0x4c4   :  { %v996_v23 = vsub.f32 2.0, %v995_v22 }
 0x4c6   :  { %v997_v24 = vmul.f32 %v1316_v21, %v996_v23 }
 0x4c8   :  { %v998_v25 = vmul.f32 %v1314_v19, %v997_v24 }
 0x4ca   :  { %999 = vst [vmem:[#allocation13] sm:$0xff] %v998_v25 }
 0x4cb   :  { %1448 = shalt.err (!%p1445_p6)
}
 0x4cc   :  { %1009 = dma.vmem_to_hbm [thread:$0]  %s1007_s21, 128, %s1597_s9, [#allocation4]  }
 0x4cd   :  { %1465 = dma.done.wait [#allocation4], 128  }
 0x4ce   :  { %1466 = vsyncadd [#allocation4], 4294967168 }
 0x4cf   :  { %1013 = vsyncpa [#allocation3], 1 }
 0x4d0   :  { %1014 = vsyncpa [#allocation6], 1 }
 0x4d1   :  { %1015 = vsyncpa [#allocation9], 1 }
 0x4d2   :  { %1016 = vsyncpa [#allocation12], 1 }
 0x4d3   :  { %1017 = vsyncpa [#allocation4], 1 }

</bundles_post_ra>
